<compile_context>
chip_gen: v6e
topology: v6e:2x2x1
jax: 0.10.0
libtpu: 0.0.40
codegen_flags: <defaults>
</compile_context>

<pallas_src>
import jax
import jax.numpy as jnp
from jax.experimental import pallas as pl
from jax.experimental.pallas import tpu as pltpu

LANE = 128
SUBLANE = 8
DEFAULT_TILE_B = 4096               # multiple of 16; comfortably double-buffers
MEGACORE_MIN_B = 1024               # below this, splitting across 2 TCs isn't worth it
VMEM_LIMIT_BYTES = 48 * 1024 * 1024 # < v7x 64 MiB physical; fine on v5e/v6e (128 MiB)


def _round_up(x, m):
    return (x + m - 1) // m * m


def mlp_kernel(x_ref, w1_ref, b1_ref, w2_ref, b2_ref, w3_ref, b3_ref, o_ref):
    # x arrives as f32 (single HBM read); cast to bf16 in-kernel for the MXU.
    x = x_ref[...].astype(jnp.bfloat16)

    h = jnp.dot(x, w1_ref[...], preferred_element_type=jnp.float32)
    h = jnp.maximum(h + b1_ref[...], 0.0)

    h = jnp.dot(h.astype(jnp.bfloat16), w2_ref[...],
                preferred_element_type=jnp.float32)
    h = jnp.maximum(h + b2_ref[...], 0.0)

    y = jnp.dot(h.astype(jnp.bfloat16), w3_ref[...],
                preferred_element_type=jnp.float32)
    o_ref[...] = (y + b3_ref[...]).astype(o_ref.dtype)


def basic_mlp_forward(x, params, *, tile_b=DEFAULT_TILE_B):
    """x: [B, n_inputs] float32. params: (fan_in, fan_out) weights, (1, fan_out) biases."""
    w1, b1, w2, b2, w3, b3 = (
        params["w1"], params["b1"],
        params["w2"], params["b2"],
        params["w3"], params["b3"],
    )
    B, n_in = x.shape
    n_actions = w3.shape[1]

    # Tile selection: large tiles amortize per-step overhead; if B is large but
    # would fit in a single tile, split into >=2 tiles so both v7x TCs get work.
    if B >= MEGACORE_MIN_B:
        tile_b = min(tile_b, _round_up(pl.cdiv(B, 2), SUBLANE))
    else:
        tile_b = min(tile_b, _round_up(B, SUBLANE))
    nb = pl.cdiv(B, tile_b)   # ragged last block is masked by Pallas; no jnp.pad copy

    # bf16 MXU inputs for the weights; biases stay f32 (bias/ReLU on f32 accumulator).
    w1_bf = w1.astype(jnp.bfloat16)
    w2_bf = w2.astype(jnp.bfloat16)
    w3_bf = w3.astype(jnp.bfloat16)
    b1_f = b1.astype(jnp.float32)
    b2_f = b2.astype(jnp.float32)
    b3_f = b3.astype(jnp.float32)

    # Constant index maps -> single block, VMEM-resident across all batch tiles.
    const = lambda a: pl.BlockSpec(a.shape, lambda i: (0, 0))

    out = pl.pallas_call(
        mlp_kernel,
        out_shape=jax.ShapeDtypeStruct((B, n_actions), jnp.float32),
        grid_spec=pltpu.PrefetchScalarGridSpec(
            num_scalar_prefetch=0,
            grid=(nb,),
            in_specs=[
                pl.BlockSpec((tile_b, n_in), lambda i: (i, 0)),
                const(w1_bf), const(b1_f),
                const(w2_bf), const(b2_f),
                const(w3_bf), const(b3_f),
            ],
            out_specs=pl.BlockSpec((tile_b, n_actions), lambda i: (i, 0)),
        ),
        compiler_params=pltpu.CompilerParams(
            dimension_semantics=("parallel",),      # megacore sharding on v7x
            vmem_limit_bytes=VMEM_LIMIT_BYTES,
        ),
    )(x, w1_bf, b1_f, w2_bf, b2_f, w3_bf, b3_f)
    return out


def init_params(key, n_inputs, n_actions):
    """Deterministic init matching nn.Linear's U(-1/sqrt(fan_in), 1/sqrt(fan_in))."""
    def linear_init(k, fan_in, fan_out):
        kw, kb = jax.random.split(k)
        bound = 1.0 / jnp.sqrt(jnp.float32(fan_in))
        # Stored as (fan_in, fan_out) == PyTorch weight.T
        w = jax.random.uniform(kw, (fan_in, fan_out), jnp.float32, -bound, bound)
        b = jax.random.uniform(kb, (1, fan_out), jnp.float32, -bound, bound)
        return w, b

    k1, k2, k3 = jax.random.split(key, 3)
    w1, b1 = linear_init(k1, n_inputs, 64)
    w2, b2 = linear_init(k2, 64, 64)
    w3, b3 = linear_init(k3, 64, n_actions)
    return {"w1": w1, "b1": b1, "w2": w2, "b2": b2, "w3": w3, "b3": b3}


def reference_forward(x, params):
    """Pure-JAX reference mirroring the kernel's bf16-input / f32-accumulate math."""
    w1 = params["w1"].astype(jnp.bfloat16)
    w2 = params["w2"].astype(jnp.bfloat16)
    w3 = params["w3"].astype(jnp.bfloat16)
    h = jnp.dot(x.astype(jnp.bfloat16), w1, preferred_element_type=jnp.float32)
    h = jnp.maximum(h + params["b1"], 0.0)
    h = jnp.dot(h.astype(jnp.bfloat16), w2, preferred_element_type=jnp.float32)
    h = jnp.maximum(h + params["b2"], 0.0)
    y = jnp.dot(h.astype(jnp.bfloat16), w3, preferred_element_type=jnp.float32)
    return y + params["b3"]


if __name__ == "__main__":
    key = jax.random.PRNGKey(0)
    n_inputs, n_actions, batch = 32, 8, 8

    kx, kp = jax.random.split(key)
    x = jax.random.normal(kx, (batch, n_inputs), jnp.float32)
    params = init_params(kp, n_inputs, n_actions)

    out = basic_mlp_forward(x, params)
    out = jax.block_until_ready(out)

    ref = reference_forward(x, params)
    assert out.shape == (batch, n_actions)
    assert jnp.allclose(out, ref, atol=1e-3, rtol=1e-3), (
        f"max abs err = {jnp.max(jnp.abs(out - ref))}")

    print("KERNEL_OK")
</pallas_src>

<mosaic_0001>
module attributes {stable_mosaic.version = 11 : i64} {
  func.func @mlp_kernel(%arg0: i32, %arg1: memref<8x32xf32, #tpu.memory_space<vmem>>, %arg2: memref<32x64xbf16, #tpu.memory_space<vmem>>, %arg3: memref<1x64xf32, #tpu.memory_space<vmem>>, %arg4: memref<64x64xbf16, #tpu.memory_space<vmem>>, %arg5: memref<1x64xf32, #tpu.memory_space<vmem>>, %arg6: memref<64x8xbf16, #tpu.memory_space<vmem>>, %arg7: memref<1x8xf32, #tpu.memory_space<vmem>>, %arg8: memref<8x8xf32, #tpu.memory_space<vmem>>) attributes {dimension_semantics = [#tpu.dimension_semantics<parallel>], iteration_bounds = array<i64: 1>, scalar_prefetch = 0 : i64, scratch_operands = 0 : i64, tpu.core_type = #tpu.core_type<tc>, window_params = [{transform_indices = @transform_0, window_bounds = array<i64: 8, 32>}, {pipeline_mode = #tpu.pipeline_mode<synchronous>, transform_indices = @transform_1, window_bounds = array<i64: 32, 64>}, {pipeline_mode = #tpu.pipeline_mode<synchronous>, transform_indices = @transform_2, window_bounds = array<i64: 1, 64>}, {pipeline_mode = #tpu.pipeline_mode<synchronous>, transform_indices = @transform_3, window_bounds = array<i64: 64, 64>}, {pipeline_mode = #tpu.pipeline_mode<synchronous>, transform_indices = @transform_4, window_bounds = array<i64: 1, 64>}, {pipeline_mode = #tpu.pipeline_mode<synchronous>, transform_indices = @transform_5, window_bounds = array<i64: 64, 8>}, {pipeline_mode = #tpu.pipeline_mode<synchronous>, transform_indices = @transform_6, window_bounds = array<i64: 1, 8>}, {transform_indices = @transform_7, window_bounds = array<i64: 8, 8>}]} {
    %c0 = arith.constant 0 : index
    %c0_0 = arith.constant 0 : index
    %0 = vector.load %arg1[%c0, %c0_0] : memref<8x32xf32, #tpu.memory_space<vmem>>, vector<8x32xf32>
    %1 = arith.truncf %0 : vector<8x32xf32> to vector<8x32xbf16>
    %c0_1 = arith.constant 0 : index
    %c0_2 = arith.constant 0 : index
    %2 = vector.load %arg2[%c0_1, %c0_2] : memref<32x64xbf16, #tpu.memory_space<vmem>>, vector<32x64xbf16>
    %cst = arith.constant dense<0.000000e+00> : vector<8x64xf32>
    %3 = tpu.matmul %1, %2, %cst {dimension_numbers = #tpu.dot_dimension_numbers<[1], [0], [0], [1], [0, 0, 1, 1], [], []>} : vector<8x32xbf16>, vector<32x64xbf16>, vector<8x64xf32> -> vector<8x64xf32>
    %c0_3 = arith.constant 0 : index
    %c0_4 = arith.constant 0 : index
    %4 = vector.load %arg3[%c0_3, %c0_4] : memref<1x64xf32, #tpu.memory_space<vmem>>, vector<1x64xf32>
    %5 = vector.broadcast %4 : vector<1x64xf32> to vector<8x64xf32>
    %6 = arith.addf %3, %5 : vector<8x64xf32>
    %cst_5 = arith.constant 0.000000e+00 : f32
    %7 = vector.broadcast %cst_5 : f32 to vector<8x64xf32>
    %8 = arith.maximumf %6, %7 : vector<8x64xf32>
    %9 = arith.truncf %8 : vector<8x64xf32> to vector<8x64xbf16>
    %c0_6 = arith.constant 0 : index
    %c0_7 = arith.constant 0 : index
    %10 = vector.load %arg4[%c0_6, %c0_7] : memref<64x64xbf16, #tpu.memory_space<vmem>>, vector<64x64xbf16>
    %cst_8 = arith.constant dense<0.000000e+00> : vector<8x64xf32>
    %11 = tpu.matmul %9, %10, %cst_8 {dimension_numbers = #tpu.dot_dimension_numbers<[1], [0], [0], [1], [0, 0, 1, 1], [], []>} : vector<8x64xbf16>, vector<64x64xbf16>, vector<8x64xf32> -> vector<8x64xf32>
    %c0_9 = arith.constant 0 : index
    %c0_10 = arith.constant 0 : index
    %12 = vector.load %arg5[%c0_9, %c0_10] : memref<1x64xf32, #tpu.memory_space<vmem>>, vector<1x64xf32>
    %13 = vector.broadcast %12 : vector<1x64xf32> to vector<8x64xf32>
    %14 = arith.addf %11, %13 : vector<8x64xf32>
    %cst_11 = arith.constant 0.000000e+00 : f32
    %15 = vector.broadcast %cst_11 : f32 to vector<8x64xf32>
    %16 = arith.maximumf %14, %15 : vector<8x64xf32>
    %17 = arith.truncf %16 : vector<8x64xf32> to vector<8x64xbf16>
    %c0_12 = arith.constant 0 : index
    %c0_13 = arith.constant 0 : index
    %18 = vector.load %arg6[%c0_12, %c0_13] : memref<64x8xbf16, #tpu.memory_space<vmem>>, vector<64x8xbf16>
    %cst_14 = arith.constant dense<0.000000e+00> : vector<8x8xf32>
    %19 = tpu.matmul %17, %18, %cst_14 {dimension_numbers = #tpu.dot_dimension_numbers<[1], [0], [0], [1], [0, 0, 1, 1], [], []>} : vector<8x64xbf16>, vector<64x8xbf16>, vector<8x8xf32> -> vector<8x8xf32>
    %c0_15 = arith.constant 0 : index
    %c0_16 = arith.constant 0 : index
    %20 = vector.load %arg7[%c0_15, %c0_16] : memref<1x8xf32, #tpu.memory_space<vmem>>, vector<1x8xf32>
    %21 = vector.broadcast %20 : vector<1x8xf32> to vector<8x8xf32>
    %22 = arith.addf %19, %21 : vector<8x8xf32>
    %c0_17 = arith.constant 0 : index
    %c0_18 = arith.constant 0 : index
    %23 = vector.load %arg8[%c0_17, %c0_18] : memref<8x8xf32, #tpu.memory_space<vmem>>, vector<8x8xf32>
    tpu.vector_store %arg8[%c0_17, %c0_18], %22 {strides = array<i32>} : memref<8x8xf32, #tpu.memory_space<vmem>>, vector<8x8xf32>,
    return
  }
  func.func @transform_0(%arg0: i32) -> (i32, i32) {
    %c0_i32 = arith.constant 0 : i32
    %c0_i32_0 = arith.constant 0 : i32
    return %arg0, %c0_i32 : i32, i32
  }
  func.func @transform_1(%arg0: i32) -> (i32, i32) {
    %c0_i32 = arith.constant 0 : i32
    %c0_i32_0 = arith.constant 0 : i32
    %c0_i32_1 = arith.constant 0 : i32
    return %c0_i32, %c0_i32_0 : i32, i32
  }
  func.func @transform_2(%arg0: i32) -> (i32, i32) {
    %c0_i32 = arith.constant 0 : i32
    %c0_i32_0 = arith.constant 0 : i32
    %c0_i32_1 = arith.constant 0 : i32
    return %c0_i32, %c0_i32_0 : i32, i32
  }
  func.func @transform_3(%arg0: i32) -> (i32, i32) {
    %c0_i32 = arith.constant 0 : i32
    %c0_i32_0 = arith.constant 0 : i32
    %c0_i32_1 = arith.constant 0 : i32
    return %c0_i32, %c0_i32_0 : i32, i32
  }
  func.func @transform_4(%arg0: i32) -> (i32, i32) {
    %c0_i32 = arith.constant 0 : i32
    %c0_i32_0 = arith.constant 0 : i32
    %c0_i32_1 = arith.constant 0 : i32
    return %c0_i32, %c0_i32_0 : i32, i32
  }
  func.func @transform_5(%arg0: i32) -> (i32, i32) {
    %c0_i32 = arith.constant 0 : i32
    %c0_i32_0 = arith.constant 0 : i32
    %c0_i32_1 = arith.constant 0 : i32
    return %c0_i32, %c0_i32_0 : i32, i32
  }
  func.func @transform_6(%arg0: i32) -> (i32, i32) {
    %c0_i32 = arith.constant 0 : i32
    %c0_i32_0 = arith.constant 0 : i32
    %c0_i32_1 = arith.constant 0 : i32
    return %c0_i32, %c0_i32_0 : i32, i32
  }
  func.func @transform_7(%arg0: i32) -> (i32, i32) {
    %c0_i32 = arith.constant 0 : i32
    %c0_i32_0 = arith.constant 0 : i32
    return %arg0, %c0_i32 : i32, i32
  }
}

</mosaic_0001>

<bundles_post_ra>
// kernel: tpu_custom_call.1
= control target key start
LH: loop header
LB: loop body
LE: loop exit
PB: predicated region body
PF: predicated region fallthrough
CT: control target
= control target key end

     0   :  { %12 = vsyncpa [#allocation3], 0  ;;  %s548_s0 = inlined_call_operand.vmem [shape: f32[8,32], index: 0, kind: input, shape index: {}]   ;;  %s549_s1 = inlined_call_operand.hbm [shape: bf16[32,64], index: 1, kind: input, shape index: {}]   ;;  %s550_s2 = inlined_call_operand.vmem [shape: f32[1,64], index: 2, kind: input, shape index: {}]   ;;  %s551_s3 = inlined_call_operand.vmem [shape: bf16[64,64], index: 3, kind: input, shape index: {}]   ;;  %s552_s4 = inlined_call_operand.hbm [shape: f32[1,64], index: 4, kind: input, shape index: {}]   ;;  %s553_s5 = inlined_call_operand.vmem [shape: bf16[64,8], index: 5, kind: input, shape index: {}]   ;;  %s554_s6 = inlined_call_operand.vmem [shape: f32[1,8], index: 6, kind: input, shape index: {}]   ;;  %s555_s7 = inlined_call_operand.hbm [shape: f32[8,8], index: 7, kind: output, shape index: {}]  }
   0x1   :  { %13 = vsyncpa [#allocation6], 0 }
   0x2   :  { %14 = vsyncpa [#allocation4], 0  ;;  %s454_s24 = smov [#allocation2]  }
   0x3   :  { %s22_s25 = sshll.u32 %s454_s24, 4  ;;  %s23_s25 = int_to_ptr.vmem [resolvable:$true] %s22_s25 }
   0x4   :  { %s396_s26 = scalar_lea.vmem %s23_s25, 256  ;;  %p401_p1 = scmp.lt.s32.totalorder %s23_s25, %s23_s25 }
   0x5   :  { %p397_p0 = scmp.ne.s32.totalorder %s23_s25, %s396_s26  ;;  %p402_p2 = scmp.lt.s32.totalorder %s396_s26, %s396_s26 }
   0x7   :  { %p403_p3 = por %p402_p2, %p401_p1 }
   0x9   :  { %p404_p4 = pnand %p403_p3, %p397_p0 }
   0xb   :  { %407 = shalt.err (!%p404_p4)
}
   0xc   :  { %s455_s27 = smov 64   ;;  %s456_s28 = smov 4  }
   0xd   :  { %28 = dma.hbm_to_vmem [thread:$0]  %s549_s1, 256, %s23_s25, [#allocation3], %s455_s27, %s455_s27, %s456_s28  }
   0xe   :  { %s457_s8 = smov [#allocation5]  }
   0xf   :  { %s39_s9 = sshll.u32 %s457_s8, 4  ;;  %s40_s9 = int_to_ptr.vmem [resolvable:$true] %s39_s9 }
  0x10   :  { %s416_s10 = scalar_lea.vmem %s40_s9, 16  ;;  %s420_s11 = scalar_lea.vmem %s40_s9, 32 }
  0x11   :  { %p417_p5 = scmp.ne.s32.totalorder %s40_s9, %s416_s10  ;;  %p421_p6 = scmp.lt.s32.totalorder %s40_s9, %s40_s9 }
  0x12   :  { %p422_p7 = scmp.lt.s32.totalorder %s420_s11, %s416_s10 }
  0x14   :  { %p423_p8 = por %p422_p7, %p421_p6 }
  0x16   :  { %p424_p9 = pnand %p423_p8, %p417_p5 }
  0x18   :  { %427 = shalt.err (!%p424_p9)
}
  0x19   :  { %42 = dma.hbm_to_vmem [thread:$0]  %s552_s4, 16, %s40_s9, [#allocation6]  }
  0x1a   :  { %448 = dma.done.wait [#allocation3], 256  }
  0x1b   :  { %449 = vsyncadd [#allocation3], 4294967040 }
  0x1c   :  { %450 = dma.done.wait [#allocation6], 16  }
  0x1d   :  { %451 = vsyncadd [#allocation6], 4294967280  ;;  %v458_v0 = vmov 0.0   ;;  %vm459_vm0 = vmmov 0   ;;  %v378_v1 = vld [vmem:[#allocation2 + $0x8] sm:$0xff]   ;;  %v379_v2 = vld [vmem:[#allocation2] sm:$0xff]  }
  0x1e   :  { %339 = vmatprep.subr.bf16.mxu0 %v458_v0  ;;  %343 = vmatprep.mubr.msk.bf16.mxu0 %vm459_vm0, %v458_v0  ;;  %v54_v3 = vld [vmem:[%s548_s0] sm:$0xff]  ;;  %v380_v4 = vld [vmem:[%s551_s3 + $0x18] sm:$0xff]   ;;  %vm79_vm1 = vcmask 261120   ;;  %v381_v5 = vld [vmem:[%s551_s3 + $0x10] sm:$0xff]   ;;  %vm164_vm2 = vcmask 523264   ;;  %s460_s8 = smov [#allocation7]  }
  0x1f   :  { %347 = vmatprep.subr.bf16.mxu1 %v458_v0  ;;  %355 = vmatprep.mubr.msk.bf16.mxu1 %vm459_vm0, %v458_v0  ;;  %v55_v6 = vpack.c.bf16 %v54_v3, %v54_v3  ;;  %v382_v7 = vld [vmem:[%s551_s3 + $0x8] sm:$0xff]   ;;  %v383_v8 = vld [vmem:[%s551_s3] sm:$0xff]   ;;  %v384_v9 = vld [vmem:[%s553_s5 + $0x18] sm:$0xff]   ;;  %s300_s9 = sshll.u32 %s460_s8, 4  ;;  %vm292_vm3 = vcmask 64512   ;;  %s301_s9 = int_to_ptr.vmem [resolvable:$true] %s300_s9 }
  0x20   :  { %340 = vmatpush3.bf16.msra.mxu0 %v378_v1  ;;  %348 = vmatpush3.bf16.msra.mxu1 %v380_v4  ;;  %v385_v10 = vld [vmem:[%s553_s5 + $0x10] sm:$0xff]   ;;  %v310_v11 = vld [vmem:[%s550_s2] ss:$0 sm:$0xff]  ;;  %v386_v19 = vld [vmem:[%s553_s5 + $0x8] sm:$0xff]   ;;  %p433_p11 = scmp.lt.s32.totalorder %s301_s9, %s301_s9 }
  0x21   :  { %341 = vmatprep.subr.bf16.mxu0 %v458_v0  ;;  %349 = vmatprep.subr.bf16.mxu1 %v458_v0  ;;  %v387_v20 = vld [vmem:[%s553_s5] sm:$0xff]   ;;  %v314_v21 = vld [vmem:[#allocation5] ss:$0 sm:$0xff]  ;;  %s428_s5 = scalar_lea.vmem %s301_s9, 128 }
  0x22   :  { %v320_v29 = vld [vmem:[%s554_s6] ss:$0 sm:$0xff]  ;;  %p429_p10 = scmp.ne.s32.totalorder %s301_s9, %s428_s5  ;;  %p434_p12 = scmp.lt.s32.totalorder %s428_s5, %s428_s5 }
  0x24   :  { %342 = vmatpush3.bf16.msra.mxu0 %v379_v2  ;;  %350 = vmatpush3.bf16.msra.mxu1 %v381_v5  ;;  %p435_p13 = por %p434_p12, %p433_p11 }
  0x25   :  { %359 = vmatprep.subr.bf16.mxu0 %v458_v0  ;;  %351 = vmatprep.subr.bf16.mxu1 %v458_v0 }
  0x26   :  { %p436_p0 = pnand %p435_p13, %p429_p10 }
  0x27   :  { %344 = vmatmul.mubr.msk.bf16.vlgmr.msra.gmra.mxu0 %vm79_vm1, %v55_v6 }
  0x28   :  { %367 = vmatprep.mubr.msk.bf16.mxu0 %vm459_vm0, %v458_v0  ;;  %352 = vmatpush3.bf16.msra.mxu1 %v382_v7 }
  0x29   :  { %353 = vmatprep.subr.bf16.mxu1 %v458_v0  ;;  %360 = vmatpush3.bf16.msra.mxu0 %v384_v9 }
  0x2a   :  { %361 = vmatprep.subr.bf16.mxu0 %v458_v0 }
  0x2c   :  { %354 = vmatpush3.bf16.msra.mxu1 %v383_v8 }
  0x2d   :  { %362 = vmatpush3.bf16.msra.mxu0 %v385_v10 }
  0x2e   :  { %363 = vmatprep.subr.bf16.mxu0 %v458_v0 }
  0x31   :  { %364 = vmatpush3.bf16.msra.mxu0 %v386_v19 }
  0x32   :  { %365 = vmatprep.subr.bf16.mxu0 %v458_v0 }
  0x35   :  { %366 = vmatpush3.bf16.msra.mxu0 %v387_v20 }
  0xe7   :  { %v117_v12 = vpop.f32.mrf.mxu0 }
  0xe8   :  { %v118_v13 = vadd.f32 %v310_v11, %v117_v12 }
  0xe9   :  { %v345_v14 = vpop.f32.mrf.mxu0 }
  0xea   :  { %v123_v15 = vmax.f32 %v118_v13, 0.0 }
  0xeb   :  { %v120_v16 = vpop.f32.mrf.mxu0 }
  0xec   :  { %v124_v17 = vpack.c.bf16 %v123_v15, %v123_v15 }
  0xed   :  { %v346_v18 = vpop.f32.mrf.mxu0 }
  0xee   :  { %356 = vmatmul.mubr.msk.bf16.vlgmr.msra.gmra.mxu1 %vm164_vm2, %v124_v17 }
 0x1ae   :  { %v202_v22 = vpop.f32.mrf.mxu1 }
 0x1af   :  { %v203_v23 = vadd.f32 %v314_v21, %v202_v22 }
 0x1b0   :  { %v357_v24 = vpop.f32.mrf.mxu1 }
 0x1b1   :  { %v208_v25 = vmax.f32 %v203_v23, 0.0 }
 0x1b2   :  { %v205_v26 = vpop.f32.mrf.mxu1 }
 0x1b3   :  { %v209_v27 = vpack.c.bf16 %v208_v25, %v208_v25 }
 0x1b4   :  { %v358_v28 = vpop.f32.mrf.mxu1 }
 0x1b5   :  { %368 = vmatmul.mubr.msk.bf16.vlgmr.msra.gmra.mxu0 %vm164_vm2, %v209_v27 }
 0x275   :  { %v286_v30 = vpop.f32.mrf.mxu0 }
 0x276   :  { %v287_v31 = vadd.f32 %v320_v29, %v286_v30 }
 0x277   :  { %v369_v32 = vpop.f32.mrf.mxu0 }
 0x278   :  { %293 = vst.msk [vmem:[#allocation7] sm:$0xff] %vm292_vm3, %v287_v31 }
 0x279   :  { %v289_v33 = vpop.f32.mrf.mxu0 }
 0x27a   :  { %439 = shalt.err (!%p436_p0)
}
 0x27b   :  { %303 = dma.vmem_to_hbm [thread:$0]  %s301_s9, 128, %s555_s7, [#allocation4]   ;;  %v370_v34 = vpop.f32.mrf.mxu0 }
 0x27c   :  { %452 = dma.done.wait [#allocation4], 128  }
 0x27d   :  { %453 = vsyncadd [#allocation4], 4294967168 }
 0x27e   :  { %307 = vsyncpa [#allocation3], 1 }
 0x27f   :  { %308 = vsyncpa [#allocation6], 1 }
 0x280   :  { %309 = vsyncpa [#allocation4], 1 }

</bundles_post_ra>
